<compile_context>
chip_gen: v5e
topology: v5e:2x2
jax: 0.10.0
libtpu: 0.0.40
codegen_flags: <defaults>
</compile_context>

<pallas_src>
import functools

import jax
import jax.numpy as jnp
from jax import lax
from jax.experimental import pallas as pl
from jax.experimental.pallas import tpu as pltpu


def _masking_kernel(params_ref, img_ref, mask_ref, img_out_ref, mask_out_ref,
                    *, tile_h):
    """One (selected view, H-tile) block per grid step.

    params_ref : (5, B) int32 SMEM  rows = [sel_view, y0, x0, box_h, box_w]
    img_ref    : (1, C,  tile_h, W) VMEM
    mask_ref   : (1, Cm, tile_h, W) VMEM  (Cm == 1 broadcasts over channels)
    """
    b = pl.program_id(0)
    h = pl.program_id(1)

    y0 = params_ref[1, b]
    x0 = params_ref[2, b]
    bh = params_ref[3, b]   # 0 when RandomErasing did not trigger (prob p)
    bw = params_ref[4, b]

    mask = mask_ref[...]                                       # (1, Cm, TH, W)
    row = lax.broadcasted_iota(jnp.int32, mask.shape, 2) + h * tile_h
    col = lax.broadcasted_iota(jnp.int32, mask.shape, 3)
    in_box = ((row >= y0) & (row < y0 + bh) &
              (col >= x0) & (col < x0 + bw))

    new_mask = jnp.where(in_box, jnp.zeros((), mask.dtype), mask)
    mask_out_ref[...] = new_mask

    # Broadcast (1, 1, TH, W) mask over the C image channels implicitly.
    img_out_ref[...] = jnp.where(new_mask != 0, img_ref[...],
                                 jnp.zeros((), img_ref.dtype))


def sample_erase_params(key, batch, num_views, height, width, *,
                        p=0.5, scale=(0.02, 0.33), ratio=(0.3, 3.3)):
    """Per-sample random camera index + kornia-style RandomErasing rectangle."""
    k_cam, k_apply, k_area, k_ratio, k_y, k_x = jax.random.split(key, 6)
    cam_idx = jax.random.randint(k_cam, (batch,), 0, num_views).astype(jnp.int32)
    apply_f = jax.random.uniform(k_apply, (batch,)) < p
    area = jax.random.uniform(k_area, (batch,),
                              minval=scale[0], maxval=scale[1]) * (height * width)
    aspect = jnp.exp(jax.random.uniform(k_ratio, (batch,),
                                        minval=jnp.log(ratio[0]),
                                        maxval=jnp.log(ratio[1])))
    box_h = jnp.clip(jnp.round(jnp.sqrt(area * aspect)), 1, height).astype(jnp.int32)
    box_w = jnp.clip(jnp.round(jnp.sqrt(area / aspect)), 1, width).astype(jnp.int32)
    y0 = (jax.random.uniform(k_y, (batch,)) * (height - box_h + 1)).astype(jnp.int32)
    x0 = (jax.random.uniform(k_x, (batch,)) * (width - box_w + 1)).astype(jnp.int32)
    # Fold the Bernoulli "apply" draw into the box: empty box == no erasing.
    # TODO(synk): kornia's exact rejection-sampling of the rectangle is
    # approximated (no retry loop); statistics differ slightly.
    box_h = jnp.where(apply_f, box_h, 0)
    box_w = jnp.where(apply_f, box_w, 0)
    return cam_idx, y0, x0, box_h, box_w


def _round_up(x, m):
    return ((x + m - 1) // m) * m


def _choose_tile_h(height, width, channels, itemsize,
                   target_block_bytes=4 << 20):
    """Largest H-tile (divisor of height; multiple of 8 unless == height) whose
    image block stays within ~target_block_bytes."""
    candidates = [th for th in range(height, 0, -1)
                  if height % th == 0 and (th == height or th % 8 == 0)]
    for th in candidates:                       # descending: biggest that fits
        if channels * th * width * itemsize <= target_block_bytes:
            return th
    return candidates[-1]


def random_single_image_masking(imgs, grids, masks, cam_idx, y0, x0, box_h, box_w):
    """Erase-and-zero only the selected view of every sample (aliased outputs)."""
    B, V, C, H, W = imgs.shape
    Cm = masks.shape[2]
    N = B * V

    # Flattened-view layout with (H, W) as the minor (sublane, lane) pair.
    imgs_flat = imgs.reshape(N, C, H, W)
    masks_flat = masks.reshape(N, Cm, H, W)

    # Scalar table (long axis last): row 0 = flattened index of selected view.
    sel_view = jnp.arange(B, dtype=jnp.int32) * V + cam_idx.astype(jnp.int32)
    params = jnp.stack([sel_view, y0, x0, box_h, box_w], axis=0).astype(jnp.int32)

    tile_h = _choose_tile_h(H, W, C, imgs.dtype.itemsize)
    num_h = H // tile_h

    # Explicit VMEM budget from the padded, double-buffered in+out blocks.
    pw = _round_up(W, 128)
    ph = _round_up(tile_h, 8)
    blk_img = C * ph * pw * imgs.dtype.itemsize
    blk_msk = Cm * ph * pw * masks.dtype.itemsize
    vmem_limit = int(min(64 << 20,
                         max(16 << 20, 2 * 2 * (blk_img + blk_msk) + (4 << 20))))

    kernel = functools.partial(_masking_kernel, tile_h=tile_h)
    view_map = lambda b, h, prm: (prm[0, b], 0, h, 0)

    out_imgs, out_masks = pl.pallas_call(
        kernel,
        out_shape=(jax.ShapeDtypeStruct((N, C, H, W), imgs.dtype),
                   jax.ShapeDtypeStruct((N, Cm, H, W), masks.dtype)),
        grid_spec=pltpu.PrefetchScalarGridSpec(
            num_scalar_prefetch=1,
            grid=(B, num_h),
            in_specs=[pl.BlockSpec((1, C, tile_h, W), view_map),
                      pl.BlockSpec((1, Cm, tile_h, W), view_map)],
            out_specs=(pl.BlockSpec((1, C, tile_h, W), view_map),
                       pl.BlockSpec((1, Cm, tile_h, W), view_map))),
        # Outputs alias the inputs: unselected views are never read or written.
        # (Inputs: 0 = params, 1 = imgs_flat, 2 = masks_flat.)
        input_output_aliases={1: 0, 2: 1},
        compiler_params=pltpu.CompilerParams(
            dimension_semantics=("parallel", "parallel"),
            vmem_limit_bytes=vmem_limit),
    )(params, imgs_flat, masks_flat)

    return (out_imgs.reshape(B, V, C, H, W),
            grids,
            out_masks.reshape(B, V, Cm, H, W))


class RandomSingleImageMasking:
    """JAX/Pallas port of dsta_mvs RandomSingleImageMasking."""

    def __init__(self, p=0.5, scale=(0.02, 0.33), ratio=(0.3, 3.3)):
        self.p = p
        self.scale = scale
        self.ratio = ratio

    def __call__(self, key, batch):
        imgs, grids, masks = batch
        B, V, _, H, W = imgs.shape
        cam_idx, y0, x0, bh, bw = sample_erase_params(
            key, B, V, H, W, p=self.p, scale=self.scale, ratio=self.ratio)
        return random_single_image_masking(imgs, grids, masks,
                                           cam_idx, y0, x0, bh, bw)


if __name__ == "__main__":
    key = jax.random.PRNGKey(0)
    k_img, k_grid, k_mask, k_aug = jax.random.split(key, 4)

    # Small multi-view batch: B=2 samples, V=3 views, C=3, H=16, W=128
    # (W a multiple of 128 keeps stores lane-dense; any W is still correct).
    B, V, C, H, W = 2, 3, 3, 16, 128
    imgs = jax.random.uniform(k_img, (B, V, C, H, W), dtype=jnp.float32)
    grids = jax.random.uniform(k_grid, (B, V, 2, H, W), dtype=jnp.float32)
    masks = (jax.random.uniform(k_mask, (B, V, 1, H, W)) > 0.2).astype(jnp.float32)

    module = RandomSingleImageMasking(p=0.5)
    out_imgs, out_grids, out_masks = module(k_aug, (imgs, grids, masks))
    jax.block_until_ready((out_imgs, out_grids, out_masks))

    # Plain-JAX reference using the SAME sampled parameters (same key/order).
    cam_idx, y0, x0, bh, bw = sample_erase_params(k_aug, B, V, H, W, p=0.5)
    row = jnp.arange(H)[:, None]
    col = jnp.arange(W)[None, :]
    in_box = ((row[None] >= y0[:, None, None]) &
              (row[None] < (y0 + bh)[:, None, None]) &
              (col[None] >= x0[:, None, None]) &
              (col[None] < (x0 + bw)[:, None, None]))          # (B, H, W)
    b_ar = jnp.arange(B)
    sel_mask = masks[b_ar, cam_idx]                            # (B, 1, H, W)
    new_sel_mask = jnp.where(in_box[:, None], 0.0, sel_mask)
    ref_masks = masks.at[b_ar, cam_idx].set(new_sel_mask)
    sel_img = imgs[b_ar, cam_idx]                              # (B, C, H, W)
    new_sel_img = jnp.where(new_sel_mask != 0, sel_img, 0.0)
    ref_imgs = imgs.at[b_ar, cam_idx].set(new_sel_img)

    assert out_imgs.shape == imgs.shape and out_masks.shape == masks.shape
    assert jnp.array_equal(out_imgs, ref_imgs)
    assert jnp.array_equal(out_masks, ref_masks)
    assert jnp.array_equal(out_grids, grids)

    print("KERNEL_OK")
</pallas_src>

<mosaic_0001>
module attributes {stable_mosaic.version = 11 : i64} {
  func.func @_masking_kernel(%arg0: i32, %arg1: i32, %arg2: memref<5x2xi32, #tpu.memory_space<smem>>, %arg3: memref<1x3x16x128xf32, #tpu.memory_space<vmem>>, %arg4: memref<1x1x16x128xf32, #tpu.memory_space<vmem>>, %arg5: memref<1x3x16x128xf32, #tpu.memory_space<vmem>>, %arg6: memref<1x1x16x128xf32, #tpu.memory_space<vmem>>) attributes {dimension_semantics = [#tpu.dimension_semantics<parallel>, #tpu.dimension_semantics<parallel>], iteration_bounds = array<i64: 2, 1>, scalar_prefetch = 1 : i64, scratch_operands = 0 : i64, tpu.core_type = #tpu.core_type<tc>, window_params = [{transform_indices = @transform_0, window_bounds = array<i64: 1, 3, 16, 128>}, {transform_indices = @transform_1, window_bounds = array<i64: 1, 1, 16, 128>}, {transform_indices = @transform_2, window_bounds = array<i64: 1, 3, 16, 128>}, {transform_indices = @transform_3, window_bounds = array<i64: 1, 1, 16, 128>}]} {
    %c1 = arith.constant 1 : index
    %0 = arith.index_cast %arg0 : i32 to index
    %1 = memref.load %arg2[%c1, %0] : memref<5x2xi32, #tpu.memory_space<smem>>
    %c2 = arith.constant 2 : index
    %2 = arith.index_cast %arg0 : i32 to index
    %3 = memref.load %arg2[%c2, %2] : memref<5x2xi32, #tpu.memory_space<smem>>
    %c3 = arith.constant 3 : index
    %4 = arith.index_cast %arg0 : i32 to index
    %5 = memref.load %arg2[%c3, %4] : memref<5x2xi32, #tpu.memory_space<smem>>
    %c4 = arith.constant 4 : index
    %6 = arith.index_cast %arg0 : i32 to index
    %7 = memref.load %arg2[%c4, %6] : memref<5x2xi32, #tpu.memory_space<smem>>
    %c0 = arith.constant 0 : index
    %c0_0 = arith.constant 0 : index
    %c0_1 = arith.constant 0 : index
    %c0_2 = arith.constant 0 : index
    %8 = vector.load %arg4[%c0, %c0_0, %c0_1, %c0_2] : memref<1x1x16x128xf32, #tpu.memory_space<vmem>>, vector<1x1x16x128xf32>
    %9 = tpu.iota {dimensions = array<i32: 2>} : vector<1x1x16x128xi32>
    %c16_i32 = arith.constant 16 : i32
    %10 = arith.muli %arg1, %c16_i32 : i32
    %11 = vector.broadcast %10 : i32 to vector<1x1x16x128xi32>
    %12 = arith.addi %9, %11 : vector<1x1x16x128xi32>
    %13 = tpu.iota {dimensions = array<i32: 3>} : vector<1x1x16x128xi32>
    %14 = vector.broadcast %1 : i32 to vector<1x1x16x128xi32>
    %15 = arith.cmpi sge, %12, %14 : vector<1x1x16x128xi32>
    %16 = arith.addi %1, %5 : i32
    %17 = vector.broadcast %16 : i32 to vector<1x1x16x128xi32>
    %18 = arith.cmpi slt, %12, %17 : vector<1x1x16x128xi32>
    %19 = arith.andi %15, %18 : vector<1x1x16x128xi1>
    %20 = vector.broadcast %3 : i32 to vector<1x1x16x128xi32>
    %21 = arith.cmpi sge, %13, %20 : vector<1x1x16x128xi32>
    %22 = arith.andi %19, %21 : vector<1x1x16x128xi1>
    %23 = arith.addi %3, %7 : i32
    %24 = vector.broadcast %23 : i32 to vector<1x1x16x128xi32>
    %25 = arith.cmpi slt, %13, %24 : vector<1x1x16x128xi32>
    %26 = arith.andi %22, %25 : vector<1x1x16x128xi1>
    %cst = arith.constant 0.000000e+00 : f32
    %27 = vector.broadcast %cst : f32 to vector<1x1x16x128xf32>
    %28 = arith.select %26, %27, %8 : vector<1x1x16x128xi1>, vector<1x1x16x128xf32>
    %c0_3 = arith.constant 0 : index
    %c0_4 = arith.constant 0 : index
    %c0_5 = arith.constant 0 : index
    %c0_6 = arith.constant 0 : index
    %29 = vector.load %arg6[%c0_3, %c0_4, %c0_5, %c0_6] : memref<1x1x16x128xf32, #tpu.memory_space<vmem>>, vector<1x1x16x128xf32>
    tpu.vector_store %arg6[%c0_3, %c0_4, %c0_5, %c0_6], %28 {strides = array<i32>} : memref<1x1x16x128xf32, #tpu.memory_space<vmem>>, vector<1x1x16x128xf32>,
    %cst_7 = arith.constant 0.000000e+00 : f32
    %30 = vector.broadcast %cst_7 : f32 to vector<1x1x16x128xf32>
    %31 = arith.cmpf one, %28, %30 : vector<1x1x16x128xf32>
    %c0_8 = arith.constant 0 : index
    %c0_9 = arith.constant 0 : index
    %c0_10 = arith.constant 0 : index
    %c0_11 = arith.constant 0 : index
    %32 = vector.load %arg3[%c0_8, %c0_9, %c0_10, %c0_11] : memref<1x3x16x128xf32, #tpu.memory_space<vmem>>, vector<1x3x16x128xf32>
    %cst_12 = arith.constant 0.000000e+00 : f32
    %33 = vector.shape_cast %31 : vector<1x1x16x128xi1> to vector<1x1x16x128xi1>
    %34 = vector.broadcast %33 : vector<1x1x16x128xi1> to vector<1x3x16x128xi1>
    %35 = vector.broadcast %cst_12 : f32 to vector<1x3x16x128xf32>
    %36 = arith.select %34, %32, %35 : vector<1x3x16x128xi1>, vector<1x3x16x128xf32>
    %c0_13 = arith.constant 0 : index
    %c0_14 = arith.constant 0 : index
    %c0_15 = arith.constant 0 : index
    %c0_16 = arith.constant 0 : index
    %37 = vector.load %arg5[%c0_13, %c0_14, %c0_15, %c0_16] : memref<1x3x16x128xf32, #tpu.memory_space<vmem>>, vector<1x3x16x128xf32>
    tpu.vector_store %arg5[%c0_13, %c0_14, %c0_15, %c0_16], %36 {strides = array<i32>} : memref<1x3x16x128xf32, #tpu.memory_space<vmem>>, vector<1x3x16x128xf32>,
    return
  }
  func.func @transform_0(%arg0: i32, %arg1: i32, %arg2: memref<5x2xi32, #tpu.memory_space<smem>>) -> (i32, i32, i32, i32) {
    %c0 = arith.constant 0 : index
    %0 = arith.index_cast %arg0 : i32 to index
    %1 = memref.load %arg2[%c0, %0] : memref<5x2xi32, #tpu.memory_space<smem>>
    %c0_i32 = arith.constant 0 : i32
    %c0_i32_0 = arith.constant 0 : i32
    %c0_i32_1 = arith.constant 0 : i32
    return %1, %c0_i32, %arg1, %c0_i32_0 : i32, i32, i32, i32
  }
  func.func @transform_1(%arg0: i32, %arg1: i32, %arg2: memref<5x2xi32, #tpu.memory_space<smem>>) -> (i32, i32, i32, i32) {
    %c0 = arith.constant 0 : index
    %0 = arith.index_cast %arg0 : i32 to index
    %1 = memref.load %arg2[%c0, %0] : memref<5x2xi32, #tpu.memory_space<smem>>
    %c0_i32 = arith.constant 0 : i32
    %c0_i32_0 = arith.constant 0 : i32
    %c0_i32_1 = arith.constant 0 : i32
    return %1, %c0_i32, %arg1, %c0_i32_0 : i32, i32, i32, i32
  }
  func.func @transform_2(%arg0: i32, %arg1: i32, %arg2: memref<5x2xi32, #tpu.memory_space<smem>>) -> (i32, i32, i32, i32) {
    %c0 = arith.constant 0 : index
    %0 = arith.index_cast %arg0 : i32 to index
    %1 = memref.load %arg2[%c0, %0] : memref<5x2xi32, #tpu.memory_space<smem>>
    %c0_i32 = arith.constant 0 : i32
    %c0_i32_0 = arith.constant 0 : i32
    %c0_i32_1 = arith.constant 0 : i32
    return %1, %c0_i32, %arg1, %c0_i32_0 : i32, i32, i32, i32
  }
  func.func @transform_3(%arg0: i32, %arg1: i32, %arg2: memref<5x2xi32, #tpu.memory_space<smem>>) -> (i32, i32, i32, i32) {
    %c0 = arith.constant 0 : index
    %0 = arith.index_cast %arg0 : i32 to index
    %1 = memref.load %arg2[%c0, %0] : memref<5x2xi32, #tpu.memory_space<smem>>
    %c0_i32 = arith.constant 0 : i32
    %c0_i32_0 = arith.constant 0 : i32
    %c0_i32_1 = arith.constant 0 : i32
    return %1, %c0_i32, %arg1, %c0_i32_0 : i32, i32, i32, i32
  }
}

</mosaic_0001>

<bundles_post_ra>
// kernel: tpu_custom_call.1
= control target key start
LH: loop header
LB: loop body
LE: loop exit
PB: predicated region body
PF: predicated region fallthrough
CT: control target
= control target key end

     0   :  { %s1028_s18 = smov [#allocation3]   ;;  %s1485_s0 = inlined_call_operand.vmem [shape: s32[5,2], index: 0, kind: input, shape index: {}]   ;;  %s1486_s1 = inlined_call_operand.hbm [shape: f32[6,3,16,128], index: 1, kind: input, shape index: {}, may-alias: {1,3}]   ;;  %s1487_s2 = inlined_call_operand.hbm [shape: f32[6,1,16,128], index: 2, kind: input, shape index: {}, may-alias: {2,4}]   ;;  %s1488_s3 = inlined_call_operand.hbm [shape: f32[6,3,16,128], index: 3, kind: output, shape index: {0}, may-alias: {1,3}]   ;;  %s1489_s4 = inlined_call_operand.hbm [shape: f32[6,1,16,128], index: 4, kind: output, shape index: {1}, may-alias: {2,4}]  }
   0x1   :  { %1509 = sst [smem:[#allocation36_spill]] %s1486_s1  ;;  %s11_s17 = sshll.u32 %s1485_s0, 4  ;;  %s12_s17 = int_to_ptr.vmem [resolvable:$true] %s11_s17 }
   0x2   :  { %1510 = sst [smem:[#allocation37_spill]] %s1487_s2 }
   0x3   :  { %1511 = sst [smem:[#allocation38_spill]] %s1488_s3 }
   0x4   :  { %1512 = sst [smem:[#allocation39_spill]] %s1489_s4 }
   0x5   :  { %14 = dma.vmem_to_smem %s12_s17, 128, %s1028_s18, [#allocation2] }
   0x6   :  { %950 = dma.done.wait [#allocation2], 128 }
   0x7   :  { %951 = vsyncadd [#allocation2], 4294967168 }
   0x8   :  { %17 = sfence }
   0x9   :  { %18 = vsyncpa [#allocation5], 0 }
   0xa   :  { %20 = vsyncpa [#allocation5 + $0x1], 0 }
   0xb   :  { %21 = vsyncpa [#allocation8], 0 }
   0xc   :  { %23 = vsyncpa [#allocation8 + $0x1], 0 }
   0xd   :  { %24 = vsyncpa [#allocation6], 0 }
   0xe   :  { %26 = vsyncpa [#allocation6 + $0x1], 0 }
   0xf   :  { %27 = vsyncpa [#allocation11], 0 }
  0x10   :  { %29 = vsyncpa [#allocation11 + $0x1], 0  ;;  %s1061_s19 = smov 0   ;;  %s1063_s20 = smov 0  }
  0x11   :  { %s1065_s21 = smov 0   ;;  %s1067_s0 = smov 0  }
  0x12   :  { %s1069_s22 = smov 0   ;;  %s1071_s23 = smov 0  }
  0x13   :  { %s1073_s24 = smov 0   ;;  %s1075_s25 = smov 0  }
  0x14   :  { %s1077_s26 = smov 0   ;;  %s1079_s27 = smov 0  }
  0x15   :  { %s1081_s28 = smov 0   ;;  %s1083_s29 = smov 0  }
  0x16   :  { %s1085_s30 = smov 0   ;;  %s1087_s5 = smov 0  }
  0x17   :  { %s1089_s6 = smov 0  }
  0x18 LB: > { %1513 = sst [smem:[#allocation23_spill]] %s978_s21  ;;  %s565_s7 = sadd.s32 4294967295, %s1026_s6   ;;  %s1026_s6 = sphi %s1089_s6, %s35_s6   ;;  %s1022_s5 = sphi %s1087_s5, %s1587_s5   ;;  %s1018_s30 = sphi %s1085_s30, %s1586_s30   ;;  %s1014_s29 = sphi %s1083_s29, %s1577_s29   ;;  %s1010_s28 = sphi %s1081_s28, %s1576_s28   ;;  %s1006_s27 = sphi %s1079_s27, %s1575_s27   ;;  %s1002_s26 = sphi %s1077_s26, %s1585_s26   ;;  %s998_s25 = sphi %s1075_s25, %s1584_s25   ;;  %s994_s24 = sphi %s1073_s24, %s1583_s24   ;;  %s990_s23 = sphi %s1071_s23, %s1582_s23   ;;  %s986_s22 = sphi %s1069_s22, %s1581_s22   ;;  %s982_s0 = sphi %s1067_s0, %s1571_s0   ;;  %s978_s21 = sphi %s1065_s21, %s1570_s21   ;;  %s974_s20 = sphi %s1063_s20, %s1580_s20   ;;  %s970_s19 = sphi %s1061_s19, %s1579_s19  }
  0x19   : > { %1514 = sst [smem:[#allocation24_spill]] %s982_s0  ;;  %s566_s8 = sadd.s32 4294967294, %s1026_s6  }
  0x1a   : > { %1515 = sst [smem:[#allocation25_spill]] %s986_s22  ;;  %s47_s9 = sadd.s32 1, %s1022_s5 }
  0x1b   : > { %1516 = sst [smem:[#allocation26_spill]] %s990_s23  ;;  %p49_p0 = scmp.ge.s32.totalorder %s47_s9, 2 }
  0x1c   : > { %1517 = sst [smem:[#allocation27_spill]] %s1010_s28  ;;  %s58_s11 = sadd.s32 1, %s1014_s29 }
  0x1d   : > { %1518 = sst [smem:[#allocation28_spill]] %s1014_s29  ;;  %p65_p1 = scmp.ne.s32.totalorder %s1014_s29, %s1010_s28 }
  0x1e   : > { %1519 = sst [smem:[#allocation29_spill]] %s1018_s30  ;;  %p1499_p2 = scmp.eq.s32.totalorder %s1026_s6, 0 }
  0x1f   : > { %s51_s10 = sld [smem:[#allocation3 + %s1022_s5]]  ;;  %s1589_s9 = smov (%p49_p0, %s47_s9), 0 }
  0x20   : > { %1520 = sst [smem:[#allocation30_spill]] %s1589_s9  ;;  %p1146_p3 = por %p1499_p2, %p65_p1 }
  0x21   : > { %p71_p4 = scmp.ne.s32.totalorder %s1010_s28, %s1006_s27  ;;  %s52_s13 = sld [smem:[#allocation3 + %s1589_s9]] }
  0x22   : > { %p1152_p5 = scmp.eq.s32.totalorder %s565_s7, 0  ;;  %s111_s15 = sld [smem:[#allocation3 + %s1022_s5]] }
  0x23   : > { %s118_s16 = sadd.s32 1, %s990_s23  ;;  %s112_s18 = sld [smem:[#allocation3 + %s1589_s9]] }
  0x24   : > { %p1160_p6 = por %p1152_p5, %p71_p4  ;;  %p128_p7 = scmp.ne.s32.totalorder %s990_s23, %s986_s22 }
  0x25   : > { %p1167_p8 = scmp.eq.s32.totalorder %s565_s7, 1  ;;  %p134_p9 = scmp.ne.s32.totalorder %s986_s22, %s982_s0 }
  0x26   : > { %s1523_s17 = scalar_select %p1160_p6, 1, 0 }
  0x27   : > { %p1173_p10 = scmp.eq.s32.totalorder %s566_s8, 1  ;;  %p1179_p11 = por %p1167_p8, %p128_p7 }
  0x28   : > { %1524 = sst [smem:[#allocation31_spill]] %s1523_s17  ;;  %s53_s7 = ssub.s32 %s51_s10, %s52_s13 }
  0x29   : > { %s141_s30 = sld [smem:[#allocation3 + %s1022_s5]]  ;;  %p1186_p12 = por %p1173_p10, %p134_p9 }
  0x2a   : > { %p56_p13 = scmp.eq.s32.totalorder %s53_s7, 0  ;;  %s142_s8 = sld [smem:[#allocation3 + %s1589_s9]] }
  0x2b   : > { %s1528_s17 = scalar_select %p1186_p12, 1, 0 }
  0x2c   : > { %s113_s0 = ssub.s32 %s111_s15, %s112_s18  ;;  %s148_s22 = sadd.s32 1, %s978_s21 }
  0x2d   : > { %s1193_s28 = scalar_select %p56_p13, %s1014_s29, %s58_s11  }
  0x2e   : > { %p116_p0 = scmp.eq.s32.totalorder %s113_s0, 0  ;;  %p158_p1 = scmp.ne.s32.totalorder %s978_s21, %s974_s20 }
  0x2f   : > { %1529 = sst [smem:[#allocation32_spill]] %s1193_s28  ;;  %p164_p4 = scmp.ne.s32.totalorder %s974_s20, %s970_s19 }
  0x30   : > { %s1201_s10 = scalar_select %p116_p0, %s990_s23, %s118_s16  }
  0x31   : > { %s143_s13 = ssub.s32 %s141_s30, %s142_s8  ;;  %p1205_p9 = por %p158_p1, %p1167_p8 }
  0x32   : > { %1530 = sst [smem:[#allocation33_spill]] %s1201_s10  ;;  %p146_p2 = scmp.eq.s32.totalorder %s143_s13, 0 }
  0x33   : > { %p1211_p13 = por %p164_p4, %p1173_p10  ;;  %s185_s0 = sand.u32 1, %s1014_s29  }
  0x34   : > { %s1217_s18 = scalar_select %p146_p2, %s978_s21, %s148_s22  }
  0x35   : > { %s1532_s11 = scalar_select %p1211_p13, 1, 0 }
  0x36   : > { %1533 = sst [smem:[#allocation34_spill]] %s1217_s18  ;;  %p1503_p0 = scmp.lt.s32.totalorder %s1026_s6, 2 }
  0x37   : > { %s596_s16 = smul.u32 48, %s185_s0  ;;  %p573_p2 = scmp.ge.s32.totalorder %s1026_s6, 1 }
  0x38   : > { %s601_s30 = scalar_select %p1146_p3, [#allocation3], [#allocation12] }
  0x39   : > { %p1226_p8 = pnand %p1503_p0, %p1146_p3  ;;  %s189_s22 = scalar_lea.vmem [#allocation4], %s596_s16 }
  0x3a   : > { %s602_s4 = scalar_select %p1146_p3, %s1022_s5, 0 }
  0x3b   : > { %s1591_s30 = smov (!%p1503_p0, %s601_s30), [#allocation16]  ;;  %s1237_s7 = sshll.u32 %s189_s22, 4 }
  0x3c   : > { %s1593_s4 = smov (!%p1503_p0, %s602_s4), 0  ;;  %1535 = sst [smem:[#allocation35_spill]] %s1237_s7 }
  0x3d   : > { %s190_s8 = sld [smem:[%s1591_s30 + %s1593_s4]]  ;;  %p233_p10 = scmp.lt.s32.totalorder %s1026_s6, 3 }
  0x3e   : > { %s1247_s28 = sld [smem:[#allocation3 + %s1022_s5]]  ;;  %s186_s30 = scalar_lea.sflag [#allocation5], %s185_s0 }
  0x3f   : > { %p1242_p1 = pnand %p573_p2, %p233_p10  ;;  %s1537_s1 = sld [smem:[#allocation36_spill]] }
  0x40   : > { %s82_s16 = sld [smem:[#allocation3 + %s1589_s9]]  ;;  %p778_p10 = pneg %p1226_p8 }
  0x43   : > { %s597_s13 = smul.u32 48, %s190_s8 }
  0x45   : > { %s197_s23 = scalar_lea.hbm %s1537_s1, %s597_s13  ;;  %s781_s21 = scalar_lea.hbm %s1537_s1, 288 }
  0x46   : > { %s198_s22 = sshll.u32 %s197_s23, 4  ;;  %s199_s22 = int_to_ptr.hbm [resolvable:$true] %s198_s22 }
  0x47   : > { %s774_s4 = sshra.s32 %s199_s22, 4  ;;  %s775_s4 = int_to_ptr.hbm [resolvable:$true] %s774_s4 }
  0x48   : > { %s776_s7 = scalar_lea.hbm %s775_s4, 48  ;;  %p782_p13 = scmp.lt.s32.totalorder %s775_s4, %s1537_s1 }
  0x49   : > { %p777_p2 = scmp.ne.s32.totalorder %s775_s4, %s776_s7  ;;  %p783_p3 = scmp.lt.s32.totalorder %s781_s21, %s776_s7 }
  0x4b   : > { %p779_p7 = pnand %p778_p10, %p777_p2  ;;  %p784_p12 = por %p783_p3, %p782_p13 }
  0x4d   : > { %p780_p0 = pneg %p779_p7 }
  0x4f   : > { %p785_p4 = pnand %p784_p12, %p780_p0 }
  0x51   : > { %788 = shalt.err (!%p785_p4)
}
  0x52   : > { %s1505_s23 = smov 128   ;;  %s1538_s0 = sld [smem:[#allocation35_spill]] }
  0x53   : > { %s1506_s21 = smov 8   ;;  %p1540_p12 = scmp.ne.s32.totalorder %s998_s25, %s994_s24 }
  0x54   : > { %s88_s13 = sadd.s32 1, %s1002_s26  ;;  %s210_s4 = sand.u32 1, %s1002_s26  }
  0x55   : > { %p1277_p7 = por %p1540_p12, %p1152_p5  ;;  %s83_s8 = ssub.s32 %s1247_s28, %s82_s16 }
  0x56   : > { %p1542_p13 = scmp.eq.s32.totalorder %s1026_s6, 0  ;;  %p1543_p0 = scmp.ne.s32.totalorder %s1002_s26, %s998_s25 }
  0x57   : > { %p86_p4 = scmp.eq.s32.totalorder %s83_s8, 0  ;;  %s570_s29 = sshll.u32 %s210_s4, 4 }
  0x58   : > { %s1539_s18 = int_to_ptr.vmem [resolvable:$true] %s1538_s0  ;;  %p97_p3 = por %p1543_p0, %p1542_p13 }
  0x59   : > { %622 = dma.hbm_to_vmem [thread:$0]  (!%p1226_p8), %s199_s22, 768, %s1539_s18, %s186_s30, %s1505_s23, %s1505_s23, %s1506_s21  }
  0x5a   : > { %p1544_p2 = scmp.lt.s32.totalorder %s1026_s6, 2  ;;  %s214_s16 = scalar_lea.vmem [#allocation7], %s570_s29 }
  0x5b   : > { %s1296_s22 = scalar_select %p86_p4, %s1002_s26, %s88_s13  }
  0x5c   : > { %p1291_p10 = pnand %p1544_p2, %p97_p3  ;;  %p1546_p5 = pmov %p1544_p2 }
  0x5d   : > { %s604_s24 = scalar_select %p97_p3, [#allocation3], [#allocation13] }
  0x5e   : > { %s605_s14 = scalar_select %p97_p3, %s1022_s5, 0 }
  0x5f   : > { %s1595_s24 = smov (!%p1546_p5, %s604_s24), [#allocation17]  ;;  %p1547_p8 = pmov %p1544_p2 }
  0x60   : > { %s225_s30 = sshll.u32 %s214_s16, 4  ;;  %s1548_s2 = sld [smem:[#allocation37_spill]]  ;;  %s226_s30 = int_to_ptr.vmem [resolvable:$true] %s225_s30 }
  0x61   : > { %s1597_s14 = smov (!%p1547_p8, %s605_s14), 0  ;;  %s211_s13 = scalar_lea.sflag [#allocation8], %s210_s4 }
  0x62   : > { %s215_s28 = sld [smem:[%s1595_s24 + %s1597_s14]]  ;;  %p808_p13 = pneg %p1291_p10 }
  0x66   : > { %s811_s14 = scalar_lea.hbm %s1548_s2, 96 }
  0x68   : > { %s586_s10 = sshll.u32 %s215_s28, 4 }
  0x69   : > { %s222_s8 = scalar_lea.hbm %s1548_s2, %s586_s10 }
  0x6a   : > { %s223_s23 = sshll.u32 %s222_s8, 4  ;;  %s224_s23 = int_to_ptr.hbm [resolvable:$true] %s223_s23 }
  0x6b   : > { %s804_s21 = sshra.s32 %s224_s23, 4  ;;  %s805_s21 = int_to_ptr.hbm [resolvable:$true] %s804_s21 }
  0x6c   : > { %s806_s1 = scalar_lea.hbm %s805_s21, 16  ;;  %p812_p4 = scmp.lt.s32.totalorder %s805_s21, %s1548_s2 }
  0x6d   : > { %p807_p12 = scmp.ne.s32.totalorder %s805_s21, %s806_s1  ;;  %p813_p2 = scmp.lt.s32.totalorder %s811_s14, %s806_s1 }
  0x6f   : > { %p809_p0 = pnand %p808_p13, %p807_p12  ;;  %p814_p5 = por %p813_p2, %p812_p4 }
  0x71   : > { %p810_p3 = pneg %p809_p0 }
  0x73   : > { %p815_p8 = pnand %p814_p5, %p810_p3 }
  0x75   : > { %818 = shalt.err (!%p815_p8)
}
  0x76   : > { %s1549_s4 = smov 8   ;;  %s1550_s10 = smov 128  }
  0x77   : > { %627 = dma.hbm_to_vmem [thread:$0]  (!%p1291_p10), %s224_s23, 256, %s226_s30, %s211_s13, %s1550_s10, %s1550_s10, %s1549_s4  }
  0x78   : > { %237 = sbr.rel (%p1242_p1) target bundleno = 199 (0xc7), region = 28  ;;  %s1551_s0 = sld [smem:[#allocation27_spill]] (!%p1242_p1) }
  0x7e   : > { %s239_s8 = sand.u32 1, %s1551_s0  }
  0x7f   : > { %s598_s24 = smul.u32 48, %s239_s8  ;;  %s240_s29 = scalar_lea.sflag [#allocation5], %s239_s8 }
  0x81   : > { %s1322_s28 = scalar_lea.vmem [#allocation4], %s598_s24 }
  0x82   : > { %953 = dma.done.wait (%p1160_p6), %s240_s29, 768  }
  0x83   : > { %955 = vsyncadd (%p1160_p6), %s240_s29, 4294966528  ;;  %s249_s1 = sand.u32 1, %s998_s25  }
  0x84   : > { %s1329_s21 = sshll.u32 %s249_s1, 4  ;;  %s250_s12 = scalar_lea.sflag [#allocation8], %s249_s1 }
  0x85   : > { %957 = dma.done.wait (%p1277_p7), %s250_s12, 256  }
  0x86   : > { %959 = vsyncadd (%p1277_p7), %s250_s12, 4294967040  ;;  %s1553_s27 = sld [smem:[#allocation29_spill]]  ;;  %v317_v0 = vlaneseq  ;;  %s1508_s2 = sand.u32 1, %s974_s20   ;;  %v350_v10 = vld [vmem:[%s1322_s28] sm:$0xff]  ;;  %v352_v11 = vld [vmem:[%s1322_s28 + $0x10] sm:$0xff] }
  0x87   : > { %s1554_s4 = sld [smem:[#allocation25_spill]]  ;;  %v351_v14 = vld [vmem:[%s1322_s28 + $0x8] sm:$0xff]  ;;  %v353_v17 = vld [vmem:[%s1322_s28 + $0x18] sm:$0xff]  ;;  %v354_v18 = vld [vmem:[%s1322_s28 + $0x20] sm:$0xff] }
  0x88   : > { %v318_v1 = vshrl.u32 %v317_v0, 7  ;;  %v325_v2 = vand.u32 127, %v317_v0  ;;  %v355_v20 = vld [vmem:[%s1322_s28 + $0x28] sm:$0xff] }
  0x8a   : > { %v319_v5 = vadd.s32 8, %v318_v1 }
  0x8c   : > { %s295_s30 = sshra.s32 %s1553_s27, 7  ;;  %s300_s16 = sand.u32 127, %s1553_s27 }
  0x8d   : > { %s587_s13 = sshll.u32 %s295_s30, 7  ;;  %s277_s9 = sand.u32 1, %s1554_s4  }
  0x8e   : > { %s588_s14 = sadd.s32 128, %s587_s13  ;;  %s590_s10 = sadd.s32 256, %s587_s13 }
  0x8f   : > { %s301_s0 = sadd.s32 %s588_s14, %s300_s16  ;;  %s305_s18 = sadd.s32 %s590_s10, %s300_s16 }
  0x90   : > { %s302_s8 = sld [smem:[#allocation3 + %s301_s0]]  ;;  %s592_s24 = sadd.s32 384, %s587_s13 }
  0x91   : > { %s306_s29 = sld [smem:[#allocation3 + %s305_s18]]  ;;  %s309_s1 = sadd.s32 %s592_s24, %s300_s16 }
  0x92   : > { %s310_s7 = sld [smem:[#allocation3 + %s309_s1]]  ;;  %s594_s12 = sadd.s32 512, %s587_s13 }
  0x93   : > { %s313_s23 = sadd.s32 %s594_s12, %s300_s16  ;;  %s575_s14 = sshll.u32 %s1508_s2, 4 }
  0x94   : > { %s314_s30 = sld [smem:[#allocation3 + %s313_s23]]  ;;  %s1344_s13 = smul.u32 48, %s277_s9 }
  0x95   : > { %s609_s23 = scalar_select %p1179_p11, [#allocation3], [#allocation14] }
  0x96   : > { %v326_v3 = vstv %s302_s8  ;;  %s1557_s0 = scalar_lea.vmem [#allocation7], %s1329_s21  ;;  %s1368_s1 = scalar_lea.vmem [#allocation10], %s575_s14 }
  0x97   : > { %v335_v4 = vstv %s306_s29  ;;  %vm327_vm0 = vcmp.ge.s32.totalorder %v318_v1, %v326_v3  ;;  %v315_v8 = vld [vmem:[%s1557_s0] sm:$0xff]  ;;  %vm328_vm4 = vcmp.ge.s32.totalorder %v319_v5, %v326_v3  ;;  %s610_s18 = scalar_select %p1179_p11, %s1553_s27, 0 }
  0x98   : > { %s329_s10 = sadd.s32 %s310_s7, %s302_s8  ;;  %vm1346_vm1 = vcmp.ge.s32.totalorder %v325_v2, %v335_v4  ;;  %s1558_s24 = smov %s1557_s0 }
  0x99   : > { %v330_v6 = vstv %s329_s10  ;;  %s1362_s8 = sld [smem:[%s609_s23 + %s610_s18]]  ;;  %v316_v13 = vld [vmem:[%s1558_s24 + $0x8] sm:$0xff]  ;;  %s1599_s27 = smov (!%p1205_p9, %s1553_s27), 0 }
  0x9a   : > { %vm331_vm2 = vcmp.lt.s32.totalorder %v318_v1, %v330_v6  ;;  %s339_s16 = sadd.s32 %s314_s30, %s306_s29  ;;  %vm332_vm5 = vcmp.lt.s32.totalorder %v319_v5, %v330_v6  ;;  %s279_s21 = scalar_lea.vmem [#allocation9], %s1344_s13 }
  0x9b   : > { %vm333_vm3 = vmand %vm327_vm0, %vm331_vm2  ;;  %v340_v9 = vstv %s339_s16  ;;  %s612_s29 = scalar_select %p1205_p9, [#allocation3], [#allocation15] }
  0x9c   : > { %vm337_vm6 = vmand %vm333_vm3, %vm1346_vm1  ;;  %vm341_vm7 = vcmp.lt.s32.totalorder %v325_v2, %v340_v9  ;;  %s393_s7 = sshll.u32 %s279_s21, 4  ;;  %s413_s23 = sshll.u32 %s1368_s1, 4  ;;  %s1389_s7 = int_to_ptr.vmem [resolvable:$true] %s393_s7  ;;  %s414_s23 = int_to_ptr.vmem [resolvable:$true] %s413_s23 }
  0x9d   : > { %vm342_vm8 = vmand %vm337_vm6, %vm341_vm7  ;;  %s1384_s12 = sld [smem:[%s612_s29 + %s1599_s27]]  ;;  %s373_s18 = scalar_lea.sflag [#allocation6], %s277_s9 }
  0x9e   : > { %v344_v12 = vsel %vm342_vm8, 0.0, %v315_v8  ;;  %vm334_vm9 = vmand %vm328_vm4, %vm332_vm5  ;;  %s1559_s27 = sld [smem:[#allocation38_spill]] }
  0x9f   : > { %346 = vst [vmem:[%s1368_s1] sm:$0xff] %v344_v12  ;;  %vm348_vm10 = vcmp.ne.f32.partialorder %v344_v12, 0.0  ;;  %vm338_vm11 = vmand %vm334_vm9, %vm1346_vm1  ;;  %s600_s30 = smul.u32 48, %s1362_s8 }
  0xa0   : > { %vm343_vm12 = vmand %vm338_vm11, %vm341_vm7  ;;  %v360_v15 = vsel %vm348_vm10, %v350_v10, 0.0  ;;  %v362_v16 = vsel %vm348_vm10, %v352_v11, 0.0  ;;  %v364_v23 = vsel %vm348_vm10, %v354_v18, 0.0 }
  0xa1   : > { %v345_v19 = vsel %vm343_vm12, 0.0, %v316_v13  ;;  %366 = vst [vmem:[%s279_s21] sm:$0xff] %v360_v15 }
  0xa2   : > { %347 = vst [vmem:[%s1368_s1 + $0x8] sm:$0xff] %v345_v19  ;;  %vm349_vm13 = vcmp.ne.f32.partialorder %v345_v19, 0.0 }
  0xa3   : > { %v361_v21 = vsel %vm349_vm13, %v351_v14, 0.0  ;;  %368 = vst [vmem:[%s279_s21 + $0x10] sm:$0xff] %v362_v16  ;;  %v363_v22 = vsel %vm349_vm13, %v353_v17, 0.0  ;;  %v365_v24 = vsel %vm349_vm13, %v355_v20, 0.0  ;;  %s595_s0 = sshll.u32 %s1384_s12, 4 }
  0xa4   : > { %367 = vst [vmem:[%s279_s21 + $0x8] sm:$0xff] %v361_v21  ;;  %s1560_s10 = smov %s1559_s27  ;;  %s392_s13 = scalar_lea.hbm %s1559_s27, %s600_s30 }
  0xa5   : > { %369 = vst [vmem:[%s279_s21 + $0x18] sm:$0xff] %v363_v22  ;;  %s395_s16 = sshll.u32 %s392_s13, 4  ;;  %s854_s14 = scalar_lea.hbm %s1560_s10, 288  ;;  %s396_s16 = int_to_ptr.hbm [resolvable:$true] %s395_s16 }
  0xa6   : > { %370 = vst [vmem:[%s279_s21 + $0x20] sm:$0xff] %v364_v23  ;;  %s848_s24 = sshra.s32 %s396_s16, 4  ;;  %s849_s24 = int_to_ptr.hbm [resolvable:$true] %s848_s24 }
  0xa7   : > { %371 = vst [vmem:[%s279_s21 + $0x28] sm:$0xff] %v365_v24  ;;  %s850_s8 = scalar_lea.hbm %s849_s24, 48  ;;  %p855_p10 = scmp.lt.s32.totalorder %s849_s24, %s1560_s10 }
  0xa8   : > { %p851_p6 = scmp.ne.s32.totalorder %s849_s24, %s850_s8  ;;  %p856_p12 = scmp.lt.s32.totalorder %s854_s14, %s850_s8 }
  0xaa   : > { %p852_p1 = pnand %p851_p6, %p1179_p11  ;;  %p857_p13 = por %p856_p12, %p855_p10 }
  0xac   : > { %p853_p7 = pneg %p852_p1 }
  0xae   : > { %p858_p0 = pnand %p857_p13, %p853_p7 }
  0xb0   : > { %861 = shalt.err (!%p858_p0)
}
  0xb1   : > { %s1031_s9 = smov 128   ;;  %s1032_s4 = smov 8  }
  0xb2   : > { %611 = dma.vmem_to_hbm [thread:$0]  (%p1179_p11), %s1389_s7, 768, %s396_s16, %s373_s18, %s1031_s9, %s1031_s9, %s1032_s4  }
  0xb3   : > { %s1561_s12 = sld [smem:[#allocation39_spill]]  ;;  %s1562_s13 = sand.u32 1, %s974_s20  }
  0xb4   : > { %s378_s24 = scalar_lea.sflag [#allocation11], %s1562_s13 }
  0xb9   : > { %s412_s28 = scalar_lea.hbm %s1561_s12, %s595_s0  ;;  %s882_s3 = scalar_lea.hbm %s1561_s12, 96 }
  0xba   : > { %s415_s27 = sshll.u32 %s412_s28, 4  ;;  %s416_s27 = int_to_ptr.hbm [resolvable:$true] %s415_s27 }
  0xbb   : > { %s876_s8 = sshra.s32 %s416_s27, 4  ;;  %s877_s8 = int_to_ptr.hbm [resolvable:$true] %s876_s8 }
  0xbc   : > { %s878_s29 = scalar_lea.hbm %s877_s8, 16  ;;  %p883_p11 = scmp.lt.s32.totalorder %s877_s8, %s1561_s12 }
  0xbd   : > { %p879_p3 = scmp.ne.s32.totalorder %s877_s8, %s878_s29  ;;  %p884_p5 = scmp.lt.s32.totalorder %s882_s3, %s878_s29 }
  0xbf   : > { %p880_p4 = pnand %p879_p3, %p1205_p9  ;;  %p885_p8 = por %p884_p5, %p883_p11 }
  0xc1   : > { %p881_p2 = pneg %p880_p4 }
  0xc3   : > { %p886_p6 = pnand %p885_p8, %p881_p2 }
  0xc5   : > { %889 = shalt.err (!%p886_p6)
}
  0xc6   : > { %614 = dma.vmem_to_hbm [thread:$0]  (%p1205_p9), %s414_s23, 256, %s416_s27, %s378_s24, %s1031_s9, %s1031_s9, %s1032_s4  }
  0xc7 PF: > { %s1563_s0 = sld [smem:[#allocation24_spill]]  ;;  %p1564_p1 = scmp.ne.s32.totalorder %s1528_s17, 0 }
  0xc8   : > { %p1565_p7 = scmp.ge.s32.totalorder %s1026_s6, 2 }
  0xca   : > { %p629_p10 = pnand %p1565_p7, %p1564_p1 }
  0xcc   : > { %p630_p12 = pneg %p629_p10 }
  0xcd   : > { %s430_s18 = sand.u32 1, %s1563_s0  }
  0xce   : > { %s431_s1 = scalar_lea.sflag [#allocation6], %s430_s18 }
  0xcf   : > { %961 = dma.done.wait (%p630_p12), %s431_s1, 768  }
  0xd0   : > { %963 = vsyncadd (%p630_p12), %s431_s1, 4294966528  ;;  %s440_s21 = sand.u32 1, %s970_s19   ;;  %p1566_p13 = scmp.ne.s32.totalorder %s1532_s11, 0 }
  0xd1   : > { %p1567_p0 = pmov %p1565_p7  ;;  %s441_s15 = scalar_lea.sflag [#allocation11], %s440_s21 }
  0xd3   : > { %p632_p3 = pnand %p1567_p0, %p1566_p13 }
  0xd5   : > { %p633_p9 = pneg %p632_p3 }
  0xd7   : > { %965 = dma.done.wait (%p633_p9), %s441_s15, 256  }
  0xd8   : > { %967 = vsyncadd (%p633_p9), %s441_s15, 4294967040  ;;  %s35_s6 = sadd.s32 1, %s1026_s6   ;;  %s1569_s23 = sld [smem:[#allocation23_spill]] }
  0xd9   : > { %p1435_p4 = scmp.ge.s32.totalorder %s35_s6, 4   ;;  %s1570_s21 = sld [smem:[#allocation34_spill]] }
  0xda   : > { %s1571_s0 = sld [smem:[#allocation25_spill]]  ;;  %s1574_s11 = smov %s1296_s22 }
  0xdb   : > { %s1572_s9 = sld [smem:[#allocation26_spill]]  ;;  %s1579_s19 = smov %s974_s20 }
  0xdc   : > { %s1573_s4 = sld [smem:[#allocation33_spill]]  ;;  %s1583_s24 = smov %s998_s25 }
  0xdd   : > { %s1575_s27 = sld [smem:[#allocation27_spill]]  ;;  %s1584_s25 = smov %s1002_s26 }
  0xde   : > { %s1576_s28 = sld [smem:[#allocation28_spill]]  ;;  %s1580_s20 = smov %s1569_s23 }
  0xdf   : > { %s1577_s29 = sld [smem:[#allocation32_spill]]  ;;  %s1585_s26 = smov %s1574_s11 }
  0xe0   : > { %s1578_s2 = sld [smem:[#allocation30_spill]]  ;;  %s1586_s30 = smov %s1022_s5 }
  0xe1   : > { %s1581_s22 = smov %s1572_s9 }
  0xe2   : > { %s1582_s23 = smov %s1573_s4  ;;  %34 = sbr.rel (!%p1435_p4) target bundleno = 24 (0x18), region = 103 }
  0xe6   : > { %s1587_s5 = smov %s1578_s2 }
  0xe7   :  { %447 = vsyncpa [#allocation5], 1 }
  0xe8   :  { %449 = vsyncpa [#allocation5 + $0x1], 1 }
  0xe9   :  { %450 = vsyncpa [#allocation8], 1 }
  0xea   :  { %452 = vsyncpa [#allocation8 + $0x1], 1 }
  0xeb   :  { %453 = vsyncpa [#allocation6], 1 }
  0xec   :  { %455 = vsyncpa [#allocation6 + $0x1], 1 }
  0xed   :  { %456 = vsyncpa [#allocation11], 1 }
  0xee   :  { %458 = vsyncpa [#allocation11 + $0x1], 1 }

</bundles_post_ra>
